<compile_context>
chip_gen: v7x
topology: tpu7x:2x2x1
jax: 0.10.0
libtpu: 0.0.40
codegen_flags: <defaults>
</compile_context>

<pallas_src>
import jax
import jax.numpy as jnp
from jax.experimental import pallas as pl
from jax.experimental.pallas import tpu as pltpu


def _round_up(x, m):
    return ((x + m - 1) // m) * m


def _graphconv_edge_kernel(x_ref, wt_ref, b_ref, o_ref):
    # x_ref : (TM, Kp)  f32 packed edge features (lane-dense)
    # wt_ref: (Kp, Np)  bf16 block-diagonal weight (tiny, resident every step)
    # b_ref : (1,  Np)  f32 tiled bias (resident)
    # o_ref : (TM, Np)  bf16 packed output
    x = x_ref[...].astype(jnp.bfloat16)          # VPU cast in-kernel: no extra HBM pass
    acc = jnp.dot(x, wt_ref[...], preferred_element_type=jnp.float32)
    acc = acc + b_ref[...]                       # f32 bias add (row broadcast)
    o_ref[...] = jnp.maximum(acc, 0.0).astype(o_ref.dtype)   # activation = ReLU, bf16 store


def graphconv_edge_forward(x, w, b, *, tm=1024, return_packed=False):
    """relu(x @ w.T + b).

    x: [E, in_feats]; w: [out_feats, in_feats] (PyTorch nn.Linear layout); b: [out_feats].
    Returns [E, out_feats] bfloat16 (f32 accumulation inside the kernel).
    If return_packed=True, returns the padded lane-dense slab [rows_pad, pack*out_pad]
    (padded rows contain relu(b), padded output columns are 0) for fused consumers.
    """
    E, in_feats = x.shape
    out_feats = w.shape[0]
    assert tm % 16 == 0, "tm must be a multiple of 16 (bf16 sublane packing)"

    # ---- lane-dense packing geometry ------------------------------------------------
    # Group `pack` edges per packed row so the feature (lane) axis is a multiple of 128.
    if in_feats <= 128:
        in_pad = max(1, pl.next_power_of_2(in_feats))   # smallest divisor of 128 >= in_feats
        pack = 128 // in_pad
    else:
        in_pad = _round_up(in_feats, 128)
        pack = 1
    kp = pack * in_pad                                   # packed K (multiple of 128)
    out_pad = _round_up(out_feats, 128 // pack)          # keep packed N a multiple of 128
    np_ = pack * out_pad                                 # packed N (multiple of 128)

    # ---- row tiling -------------------------------------------------------------------
    rows = pl.cdiv(E, pack)
    # >=256 rows/tile (amortize per-step overhead), <=1024, and aim for >=4 grid steps so
    # v7x's two TensorCores get work and input/output DMA overlaps compute.
    tm_eff = min(tm, 1024, max(256, _round_up(pl.cdiv(rows, 4), 256)))
    rows_pad = _round_up(rows, tm_eff)
    e_pad = rows_pad * pack

    # ---- host-side packing (weight/bias are tiny; x pad only when shapes require it) ---
    x = jnp.asarray(x, jnp.float32)
    if e_pad != E or in_pad != in_feats:
        x = jnp.pad(x, ((0, e_pad - E), (0, in_pad - in_feats)))
    x_packed = x.reshape(rows_pad, kp)                   # contiguous reshape (no copy)

    wt = jnp.asarray(w, jnp.float32).T                   # [in, out]
    wt = jnp.pad(wt, ((0, in_pad - in_feats), (0, out_pad - out_feats)))
    # Block-diagonal weight: column block p of (x_packed @ w_block) == edge(pack*r+p) @ w.T.
    w_block = jnp.kron(jnp.eye(pack, dtype=jnp.float32), wt).astype(jnp.bfloat16)  # [kp, np_]
    b_pad = jnp.pad(jnp.asarray(b, jnp.float32), (0, out_pad - out_feats))
    b_packed = jnp.tile(b_pad, pack).reshape(1, np_)

    grid = (rows_pad // tm_eff,)

    # Advisory cost (actual HBM traffic: f32 x read, bf16 out write, resident W/b).
    cost = pl.CostEstimate(
        flops=2 * rows_pad * kp * np_,
        transcendentals=0,
        bytes_accessed=(rows_pad * kp * 4 + rows_pad * np_ * 2
                        + kp * np_ * 2 + np_ * 4),
    )

    # VMEM: double-buffered x/out pipeline tiles + resident weight/bias + the
    # Mosaic-internal f32 matmul/epilogue intermediate (~tm_eff * np_ * 4 bytes).
    vmem_need = (2 * tm_eff * kp * 4          # x tiles, f32, double-buffered
                 + 2 * tm_eff * np_ * 2       # out tiles, bf16, double-buffered
                 + tm_eff * np_ * 4           # internal f32 accumulator / epilogue
                 + kp * np_ * 2 + np_ * 4)    # resident block-diag weight + bias
    vmem_limit = min(max(int(vmem_need) + (4 << 20), 32 << 20), 64 << 20)  # fits v7x too

    out_packed = pl.pallas_call(
        _graphconv_edge_kernel,
        out_shape=jax.ShapeDtypeStruct((rows_pad, np_), jnp.bfloat16),
        grid_spec=pltpu.PrefetchScalarGridSpec(
            num_scalar_prefetch=0,
            grid=grid,
            in_specs=[
                pl.BlockSpec((tm_eff, kp), lambda i: (i, 0)),   # packed edge-feature tile
                pl.BlockSpec((kp, np_), lambda i: (0, 0)),      # block-diag weight (resident)
                pl.BlockSpec((1, np_), lambda i: (0, 0)),       # tiled bias (resident)
                # NOTE: bump x spec to pipeline_mode=pl.Buffered(3) only if xprof shows
                # exposed input DMA at step boundaries.
            ],
            out_specs=pl.BlockSpec((tm_eff, np_), lambda i: (i, 0)),
        ),
        compiler_params=pltpu.CompilerParams(
            dimension_semantics=("parallel",),   # independent rows -> megacore / 2-TC shard
            vmem_limit_bytes=int(vmem_limit),
        ),
        cost_estimate=cost,
    )(x_packed, w_block, b_packed)

    if return_packed:
        # Fused-consumer path: avoid the output unpack/slice HBM pass. Padded rows hold
        # relu(b) and padded feature columns hold 0; the consumer must mask/ignore them.
        return out_packed

    out = out_packed.reshape(rows_pad * pack, out_pad)   # contiguous reshape (no copy)
    if e_pad != E or out_pad != out_feats:
        # Non-tile-aligned slice materializes a copy for a standalone call; in a pipeline,
        # prefer return_packed=True and let the consumer take the padded slab.
        out = out[:E, :out_feats]
    return out


def graphconv_edge_reference(x, w, b):
    return jnp.maximum(x @ w.T + b[None, :], 0.0)


if __name__ == "__main__":
    key = jax.random.PRNGKey(0)
    k_x, k_w, k_b = jax.random.split(key, 3)

    # Small shapes implied by the module: E edges, in_feats -> out_feats.
    # E intentionally not a multiple of pack/tile to exercise the padding path.
    E, in_feats, out_feats = 1000, 32, 64

    x = jax.random.normal(k_x, (E, in_feats), dtype=jnp.float32)

    # PyTorch nn.Linear-style uniform init bound.
    bound = 1.0 / (in_feats ** 0.5)
    w = jax.random.uniform(k_w, (out_feats, in_feats), minval=-bound, maxval=bound,
                           dtype=jnp.float32)
    b = jax.random.uniform(k_b, (out_feats,), minval=-bound, maxval=bound,
                           dtype=jnp.float32)

    fwd = jax.jit(graphconv_edge_forward)
    out = jax.block_until_ready(fwd(x, w, b))
    assert out.shape == (E, out_feats)
    assert out.dtype == jnp.bfloat16
    out_f32 = out.astype(jnp.float32)

    # Check against a bf16-matched reference (same quantization points as the kernel).
    xb = x.astype(jnp.bfloat16).astype(jnp.float32)
    wb = w.astype(jnp.bfloat16).astype(jnp.float32)
    ref_bf16 = jnp.maximum(xb @ wb.T + b[None, :], 0.0)
    ref_bf16 = ref_bf16.astype(jnp.bfloat16).astype(jnp.float32)
    assert jnp.allclose(out_f32, ref_bf16, atol=2e-2, rtol=2e-2), "mismatch vs bf16 reference"

    # Loose sanity check against the full-f32 reference (bf16 quantization only).
    ref_f32 = graphconv_edge_reference(x, w, b)
    assert jnp.allclose(out_f32, ref_f32, atol=5e-2, rtol=5e-2), "mismatch vs f32 reference"

    # TODO(synk): DGL graph plumbing (edge.data dict handling / message passing) is outside
    # the kernel; only the Linear + ReLU math of GraphConv_edge.forward is implemented.
    print("KERNEL_OK")
</pallas_src>

<mosaic_0001>
module attributes {stable_mosaic.version = 11 : i64} {
  func.func @_graphconv_edge_kernel(%arg0: i32, %arg1: memref<256x128xf32, #tpu.memory_space<vmem>>, %arg2: memref<128x256xbf16, #tpu.memory_space<vmem>>, %arg3: memref<1x256xf32, #tpu.memory_space<vmem>>, %arg4: memref<256x256xbf16, #tpu.memory_space<vmem>>) attributes {dimension_semantics = [#tpu.dimension_semantics<parallel>], iteration_bounds = array<i64: 1>, scalar_prefetch = 0 : i64, scratch_operands = 0 : i64, tpu.core_type = #tpu.core_type<tc>, window_params = [{transform_indices = @transform_0, window_bounds = array<i64: 256, 128>}, {pipeline_mode = #tpu.pipeline_mode<synchronous>, transform_indices = @transform_1, window_bounds = array<i64: 128, 256>}, {pipeline_mode = #tpu.pipeline_mode<synchronous>, transform_indices = @transform_2, window_bounds = array<i64: 1, 256>}, {transform_indices = @transform_3, window_bounds = array<i64: 256, 256>}]} {
    %c0 = arith.constant 0 : index
    %c0_0 = arith.constant 0 : index
    %0 = vector.load %arg1[%c0, %c0_0] : memref<256x128xf32, #tpu.memory_space<vmem>>, vector<256x128xf32>
    %1 = arith.truncf %0 : vector<256x128xf32> to vector<256x128xbf16>
    %c0_1 = arith.constant 0 : index
    %c0_2 = arith.constant 0 : index
    %2 = vector.load %arg2[%c0_1, %c0_2] : memref<128x256xbf16, #tpu.memory_space<vmem>>, vector<128x256xbf16>
    %cst = arith.constant dense<0.000000e+00> : vector<256x256xf32>
    %3 = tpu.matmul %1, %2, %cst {dimension_numbers = #tpu.dot_dimension_numbers<[1], [0], [0], [1], [0, 0, 1, 1], [], []>} : vector<256x128xbf16>, vector<128x256xbf16>, vector<256x256xf32> -> vector<256x256xf32>
    %c0_3 = arith.constant 0 : index
    %c0_4 = arith.constant 0 : index
    %4 = vector.load %arg3[%c0_3, %c0_4] : memref<1x256xf32, #tpu.memory_space<vmem>>, vector<1x256xf32>
    %5 = vector.broadcast %4 : vector<1x256xf32> to vector<256x256xf32>
    %6 = arith.addf %3, %5 : vector<256x256xf32>
    %cst_5 = arith.constant 0.000000e+00 : f32
    %7 = vector.broadcast %cst_5 : f32 to vector<256x256xf32>
    %8 = arith.maximumf %6, %7 : vector<256x256xf32>
    %9 = arith.truncf %8 : vector<256x256xf32> to vector<256x256xbf16>
    %c0_6 = arith.constant 0 : index
    %c0_7 = arith.constant 0 : index
    %10 = vector.load %arg4[%c0_6, %c0_7] : memref<256x256xbf16, #tpu.memory_space<vmem>>, vector<256x256xbf16>
    tpu.vector_store %arg4[%c0_6, %c0_7], %9 {strides = array<i32>} : memref<256x256xbf16, #tpu.memory_space<vmem>>, vector<256x256xbf16>,
    return
  }
  func.func @transform_0(%arg0: i32) -> (i32, i32) {
    %c0_i32 = arith.constant 0 : i32
    %c0_i32_0 = arith.constant 0 : i32
    return %arg0, %c0_i32 : i32, i32
  }
  func.func @transform_1(%arg0: i32) -> (i32, i32) {
    %c0_i32 = arith.constant 0 : i32
    %c0_i32_0 = arith.constant 0 : i32
    %c0_i32_1 = arith.constant 0 : i32
    return %c0_i32, %c0_i32_0 : i32, i32
  }
  func.func @transform_2(%arg0: i32) -> (i32, i32) {
    %c0_i32 = arith.constant 0 : i32
    %c0_i32_0 = arith.constant 0 : i32
    %c0_i32_1 = arith.constant 0 : i32
    return %c0_i32, %c0_i32_0 : i32, i32
  }
  func.func @transform_3(%arg0: i32) -> (i32, i32) {
    %c0_i32 = arith.constant 0 : i32
    %c0_i32_0 = arith.constant 0 : i32
    return %arg0, %c0_i32 : i32, i32
  }
}

</mosaic_0001>

<bundles_post_ra>
// kernel: tile.8
= control target key start
LH: loop header
LB: loop body
LE: loop exit
PB: predicated region body
PF: predicated region fallthrough
CT: control target
= control target key end

     0   :  { %s22_s0 = inlined_call_operand.vmem [shape: f32[64], index: 0, kind: input, shape index: {}]   ;;  %s23_s1 = inlined_call_operand.vmem [shape: f32[4,64], index: 1, kind: output, shape index: {}]  }
   0x1   :  { %v4_v0 = vld [vmem:[%s22_s0] ss:$0 sm:$0xff] }
   0x2   :  { %5 = vst [vmem:[%s23_s1] sm:$0xf] %v4_v0 }

// kernel: tile.9
= control target key start
LH: loop header
LB: loop body
LE: loop exit
PB: predicated region body
PF: predicated region fallthrough
CT: control target
= control target key end

     0   :  { %s6_s8 = smov 3  ;;  %vm8_vm0 = vcmask 523264   ;;  %s30_s9 = smov 64   ;;  %vm15_vm1 = vcmask 1048064   ;;  %s50_s0 = inlined_call_operand.vmem [shape: f32[4,64], index: 0, kind: input, shape index: {}]   ;;  %s51_s1 = inlined_call_operand.vmem [shape: f32[1,256], index: 1, kind: output, shape index: {}]  }
   0x1   :  { %v4_v0 = vld [vmem:[%s50_s0] sm:$0xf]  ;;  %s11_s0 = smov 3 }
   0x2   :  { %5 = vst [vmem:[#allocation1] sm:$0xf] %v4_v0 }
   0x9   :  { %v12_v1 = vld [vmem:[#allocation1 + $0x1] ss:$2 sm:%s11_s0]   ;;  %v7_v2 = vld [vmem:[#allocation1] ss:$2 sm:%s6_s8]  }
   0xa   :  { %13 = vrot.lane.b32.xlu0 %v12_v1, %s30_s9  ;;  %9 = vst.msk [vmem:[#allocation0] ss:$8 sm:$0x3] %vm8_vm0, %v7_v2  }
  0x7c   :  { %v14_v3 = vpop.permute.xlu0 %13  }
  0x7d   :  { %16 = vst.msk [vmem:[#allocation0] ss:$8 sm:$0x3] %vm15_vm1, %v14_v3  }
  0x84   :  { %v20_v4 = vld [vmem:[#allocation0] sm:$0x1]  ;;  %v24_v5 = vld [vmem:[#allocation0 + $0x8] sm:$0x1] }
  0x85   :  { %22 = vst [vmem:[%s51_s1] sm:$0x1] %v20_v4  ;;  %28 = vst [vmem:[%s51_s1 + $0x1] sm:$0x1] %v24_v5 }

// kernel: graphconv_edge_forward.1
= control target key start
LH: loop header
LB: loop body
LE: loop exit
PB: predicated region body
PF: predicated region fallthrough
CT: control target
= control target key end

     0   :  { %v777_v1 = vmov 0   ;;  %s1125_s1 = inlined_call_operand.vmem [shape: bf16[128,256], index: 1, kind: input, shape index: {}]   ;;  %s1126_s0 = inlined_call_operand.vmem [shape: f32[256,128], index: 0, kind: input, shape index: {}]   ;;  %s1127_s2 = inlined_call_operand.vmem [shape: f32[1,256], index: 2, kind: input, shape index: {}]   ;;  %s1128_s3 = inlined_call_operand.vmem [shape: bf16[256,256], index: 3, kind: output, shape index: {}]  }
   0x1   :  { %v753_v0 = vld [vmem:[%s1125_s1 + $0x4] ss:$8 sps:$4 sm:$0xff]   ;;  %203 = vmatprep.mubr.bf16.mxu0 %v777_v1  ;;  %283 = vmatprep.mubr.bf16.mxu1 %v777_v1  ;;  %v755_v2 = vld [vmem:[%s1125_s1] ss:$8 sps:$4 sm:$0xff]   ;;  %v756_v3 = vld [vmem:[%s1125_s1 + $0x14] ss:$8 sps:$4 sm:$0xff]  }
   0x2   :  { %171 = vmatprep.subr.bf16.mxu0 %v753_v0  ;;  %736 = vmatprep.subr.bf16.mxu1 %v753_v0  ;;  %v758_v4 = vld [vmem:[%s1125_s1 + $0x10] ss:$8 sps:$4 sm:$0xff]   ;;  %v759_v5 = vld [vmem:[%s1125_s1 + $0x24] ss:$8 sps:$4 sm:$0xff]   ;;  %v761_v6 = vld [vmem:[%s1125_s1 + $0x20] ss:$8 sps:$4 sm:$0xff]  }
   0x3   :  { %172 = vmatpush1.bf16.msra.mxu0 %v755_v2  ;;  %744 = vmatpush1.bf16.msra.mxu1 %v755_v2  ;;  %v762_v7 = vld [vmem:[%s1125_s1 + $0x34] ss:$8 sps:$4 sm:$0xff]   ;;  %v764_v8 = vld [vmem:[%s1125_s1 + $0x30] ss:$8 sps:$4 sm:$0xff]   ;;  %v765_v9 = vld [vmem:[%s1125_s1 + $0x44] ss:$8 sps:$4 sm:$0xff]   ;;  %v81_v2 = vlaneseq }
   0x4   :  { %173 = vmatprep.subr.bf16.mxu0 %v756_v3  ;;  %737 = vmatprep.subr.bf16.mxu1 %v756_v3  ;;  %v767_v10 = vld [vmem:[%s1125_s1 + $0x40] ss:$8 sps:$4 sm:$0xff]   ;;  %v768_v11 = vld [vmem:[%s1125_s1 + $0x54] ss:$8 sps:$4 sm:$0xff]   ;;  %v770_v12 = vld [vmem:[%s1125_s1 + $0x50] ss:$8 sps:$4 sm:$0xff]  }
   0x5   :  { %v771_v13 = vld [vmem:[%s1125_s1 + $0x64] ss:$8 sps:$4 sm:$0xff]   ;;  %v773_v14 = vld [vmem:[%s1125_s1 + $0x60] ss:$8 sps:$4 sm:$0xff]   ;;  %v774_v15 = vld [vmem:[%s1125_s1 + $0x74] ss:$8 sps:$4 sm:$0xff]  }
   0x6   :  { %v776_v16 = vld [vmem:[%s1125_s1 + $0x70] ss:$8 sps:$4 sm:$0xff]   ;;  %v15_v17 = vld [vmem:[%s1126_s0] sm:$0xff]  ;;  %v16_v18 = vld [vmem:[%s1126_s0 + $0x8] sm:$0xff]  ;;  %v82_v3 = vshrl.u32 %v81_v2, 7 }
   0x7   :  { %174 = vmatpush1.bf16.msra.mxu0 %v758_v4  ;;  %745 = vmatpush1.bf16.msra.mxu1 %v758_v4  ;;  %v31_v19 = vld [vmem:[%s1126_s0 + $0x80] sm:$0xff]  ;;  %v32_v20 = vld [vmem:[%s1126_s0 + $0x88] sm:$0xff]  ;;  %v47_v21 = vpack.c.bf16 %v16_v18, %v15_v17  ;;  %v17_v23 = vld [vmem:[%s1126_s0 + $0x10] sm:$0xff] }
   0x8   :  { %175 = vmatprep.subr.bf16.mxu0 %v759_v5  ;;  %738 = vmatprep.subr.bf16.mxu1 %v759_v5  ;;  %v55_v22 = vpack.c.bf16 %v32_v20, %v31_v19  ;;  %v18_v24 = vld [vmem:[%s1126_s0 + $0x18] sm:$0xff]  ;;  %v33_v25 = vld [vmem:[%s1126_s0 + $0x90] sm:$0xff]  ;;  %v19_v29 = vld [vmem:[%s1126_s0 + $0x20] sm:$0xff]  ;;  %v83_v4 = vsub.s32 0, %v82_v3  ;;  %v87_v5 = vsub.s32 1, %v82_v3 }
   0x9   :  { %v34_v26 = vld [vmem:[%s1126_s0 + $0x98] sm:$0xff]  ;;  %v48_v27 = vpack.c.bf16 %v18_v24, %v17_v23  ;;  %v20_v30 = vld [vmem:[%s1126_s0 + $0x28] sm:$0xff]  ;;  %v35_v31 = vld [vmem:[%s1126_s0 + $0xa0] sm:$0xff] }
   0xa   :  { %v56_v28 = vpack.c.bf16 %v34_v26, %v33_v25  ;;  %v36_v32 = vld [vmem:[%s1126_s0 + $0xa8] sm:$0xff]  ;;  %v49_v33 = vpack.c.bf16 %v20_v30, %v19_v29  ;;  %v21_v35 = vld [vmem:[%s1126_s0 + $0x30] sm:$0xff]  ;;  %v22_v36 = vld [vmem:[%s1126_s0 + $0x38] sm:$0xff] }
   0xb   :  { %176 = vmatpush1.bf16.msra.mxu0 %v761_v6  ;;  %746 = vmatpush1.bf16.msra.mxu1 %v761_v6  ;;  %v57_v34 = vpack.c.bf16 %v36_v32, %v35_v31  ;;  %v37_v37 = vld [vmem:[%s1126_s0 + $0xb0] sm:$0xff]  ;;  %v38_v38 = vld [vmem:[%s1126_s0 + $0xb8] sm:$0xff]  ;;  %v50_v39 = vpack.c.bf16 %v22_v36, %v21_v35  ;;  %v23_v41 = vld [vmem:[%s1126_s0 + $0x40] sm:$0xff] }
   0xc   :  { %177 = vmatprep.subr.bf16.mxu0 %v762_v7  ;;  %739 = vmatprep.subr.bf16.mxu1 %v762_v7  ;;  %v58_v40 = vpack.c.bf16 %v38_v38, %v37_v37  ;;  %v24_v42 = vld [vmem:[%s1126_s0 + $0x48] sm:$0xff]  ;;  %v39_v43 = vld [vmem:[%s1126_s0 + $0xc0] sm:$0xff]  ;;  %v25_v47 = vld [vmem:[%s1126_s0 + $0x50] sm:$0xff] }
   0xd   :  { %v40_v44 = vld [vmem:[%s1126_s0 + $0xc8] sm:$0xff]  ;;  %v51_v45 = vpack.c.bf16 %v24_v42, %v23_v41  ;;  %v26_v48 = vld [vmem:[%s1126_s0 + $0x58] sm:$0xff]  ;;  %v41_v49 = vld [vmem:[%s1126_s0 + $0xd0] sm:$0xff] }
   0xe   :  { %v59_v46 = vpack.c.bf16 %v40_v44, %v39_v43  ;;  %v42_v50 = vld [vmem:[%s1126_s0 + $0xd8] sm:$0xff]  ;;  %v52_v51 = vpack.c.bf16 %v26_v48, %v25_v47  ;;  %v27_v53 = vld [vmem:[%s1126_s0 + $0x60] sm:$0xff]  ;;  %v28_v54 = vld [vmem:[%s1126_s0 + $0x68] sm:$0xff] }
   0xf   :  { %178 = vmatpush1.bf16.msra.mxu0 %v764_v8  ;;  %747 = vmatpush1.bf16.msra.mxu1 %v764_v8  ;;  %v60_v52 = vpack.c.bf16 %v42_v50, %v41_v49  ;;  %v43_v55 = vld [vmem:[%s1126_s0 + $0xe0] sm:$0xff]  ;;  %v44_v56 = vld [vmem:[%s1126_s0 + $0xe8] sm:$0xff]  ;;  %v53_v57 = vpack.c.bf16 %v28_v54, %v27_v53  ;;  %v29_v59 = vld [vmem:[%s1126_s0 + $0x70] sm:$0xff] }
  0x10   :  { %179 = vmatprep.subr.bf16.mxu0 %v765_v9  ;;  %740 = vmatprep.subr.bf16.mxu1 %v765_v9  ;;  %v61_v58 = vpack.c.bf16 %v44_v56, %v43_v55  ;;  %v30_v60 = vld [vmem:[%s1126_s0 + $0x78] sm:$0xff]  ;;  %v45_v61 = vld [vmem:[%s1126_s0 + $0xf0] sm:$0xff] }
  0x11   :  { %v46_v62 = vld [vmem:[%s1126_s0 + $0xf8] sm:$0xff]  ;;  %v54_v63 = vpack.c.bf16 %v30_v60, %v29_v59 }
  0x12   :  { %v62_v0 = vpack.c.bf16 %v46_v62, %v45_v61 }
  0x13   :  { %180 = vmatpush1.bf16.msra.mxu0 %v767_v10  ;;  %748 = vmatpush1.bf16.msra.mxu1 %v767_v10 }
  0x14   :  { %181 = vmatprep.subr.bf16.mxu0 %v768_v11  ;;  %741 = vmatprep.subr.bf16.mxu1 %v768_v11 }
  0x17   :  { %182 = vmatpush1.bf16.msra.mxu0 %v770_v12  ;;  %749 = vmatpush1.bf16.msra.mxu1 %v770_v12 }
  0x18   :  { %183 = vmatprep.subr.bf16.mxu0 %v771_v13  ;;  %742 = vmatprep.subr.bf16.mxu1 %v771_v13 }
  0x1b   :  { %184 = vmatpush1.bf16.msra.mxu0 %v773_v14  ;;  %750 = vmatpush1.bf16.msra.mxu1 %v773_v14 }
  0x1c   :  { %185 = vmatprep.subr.bf16.mxu0 %v774_v15  ;;  %743 = vmatprep.subr.bf16.mxu1 %v774_v15 }
  0x1f   :  { %186 = vmatpush1.bf16.msra.mxu0 %v776_v16  ;;  %751 = vmatpush1.bf16.msra.mxu1 %v776_v16 }
  0x22   :  { %204 = vmatmul.mubr.bf16.vlgmr.msra.gmra.mrb[0].mxu0 %v47_v21  ;;  %284 = vmatmul.mubr.bf16.vlgmr.msra.gmra.mrb[0].mxu1 %v55_v22 }
  0x23   :  { %213 = vmatprep.mubr.bf16.mxu0 %v777_v1  ;;  %293 = vmatprep.mubr.bf16.mxu1 %v777_v1 }
  0x2a   :  { %214 = vmatmul.mubr.bf16.gmra.mrb[4].mxu0 %v48_v27  ;;  %294 = vmatmul.mubr.bf16.gmra.mrb[4].mxu1 %v56_v28 }
  0x2b   :  { %223 = vmatprep.mubr.bf16.mxu0 %v777_v1  ;;  %303 = vmatprep.mubr.bf16.mxu1 %v777_v1 }
  0x32   :  { %224 = vmatmul.mubr.bf16.gmra.mrb[8].mxu0 %v49_v33  ;;  %304 = vmatmul.mubr.bf16.gmra.mrb[8].mxu1 %v57_v34 }
  0x33   :  { %233 = vmatprep.mubr.bf16.mxu0 %v777_v1  ;;  %313 = vmatprep.mubr.bf16.mxu1 %v777_v1 }
  0x3a   :  { %234 = vmatmul.mubr.bf16.gmra.mrb[12].mxu0 %v50_v39  ;;  %314 = vmatmul.mubr.bf16.gmra.mrb[12].mxu1 %v58_v40 }
  0x3b   :  { %243 = vmatprep.mubr.bf16.mxu0 %v777_v1  ;;  %323 = vmatprep.mubr.bf16.mxu1 %v777_v1 }
  0x42   :  { %244 = vmatmul.mubr.bf16.gmra.mrb[16].mxu0 %v51_v45  ;;  %324 = vmatmul.mubr.bf16.gmra.mrb[16].mxu1 %v59_v46 }
  0x43   :  { %253 = vmatprep.mubr.bf16.mxu0 %v777_v1  ;;  %333 = vmatprep.mubr.bf16.mxu1 %v777_v1 }
  0x4a   :  { %254 = vmatmul.mubr.bf16.gmra.mrb[20].mxu0 %v52_v51  ;;  %334 = vmatmul.mubr.bf16.gmra.mrb[20].mxu1 %v60_v52 }
  0x4b   :  { %263 = vmatprep.mubr.bf16.mxu0 %v777_v1  ;;  %343 = vmatprep.mubr.bf16.mxu1 %v777_v1 }
  0x52   :  { %264 = vmatmul.mubr.bf16.gmra.mrb[24].mxu0 %v53_v57  ;;  %344 = vmatmul.mubr.bf16.gmra.mrb[24].mxu1 %v61_v58 }
  0x53   :  { %273 = vmatprep.mubr.bf16.mxu0 %v777_v1  ;;  %353 = vmatprep.mubr.bf16.mxu1 %v777_v1  ;;  %v79_v1 = vld [vmem:[%s1127_s2] sm:$0x3] }
  0x54   :  { %v961_v6 = vrot.slane %v79_v1, %v83_v4  ;;  %v963_v7 = vrot.slane %v79_v1, %v87_v5 }
  0x5a   :  { %274 = vmatmul.mubr.bf16.gmra.mrb[28].mxu0 %v54_v63  ;;  %354 = vmatmul.mubr.bf16.gmra.mrb[28].mxu1 %v62_v0 }
  0xf5   :  { %v205_v8 = vpop.f32.mrb[0].mxu0  ;;  %v285_v9 = vpop.f32.mrb[0].mxu1 }
  0xf6   :  { %v206_v10 = vadd.f32 %v205_v8, %v961_v6  ;;  %v286_v11 = vadd.f32 %v285_v9, %v961_v6  ;;  %v207_v12 = vpop.f32.mrb[1].mxu0  ;;  %v287_v13 = vpop.f32.mrb[1].mxu1 }
  0xf7   :  { %v208_v14 = vadd.f32 %v207_v12, %v963_v7  ;;  %v288_v15 = vadd.f32 %v287_v13, %v963_v7  ;;  %v209_v16 = vpop.f32.mrb[2].mxu0  ;;  %v289_v17 = vpop.f32.mrb[2].mxu1 }
  0xf8   :  { %v364_v18 = vmax.f32 %v206_v10, 0.0  ;;  %v396_v19 = vmax.f32 %v286_v11, 0.0  ;;  %v210_v20 = vadd.f32 %v209_v16, %v961_v6  ;;  %v290_v21 = vadd.f32 %v289_v17, %v961_v6  ;;  %v211_v22 = vpop.f32.mrb[3].mxu0  ;;  %v291_v23 = vpop.f32.mrb[3].mxu1 }
  0xf9   :  { %v365_v24 = vmax.f32 %v208_v14, 0.0  ;;  %v397_v25 = vmax.f32 %v288_v15, 0.0  ;;  %v212_v26 = vadd.f32 %v211_v22, %v963_v7  ;;  %v292_v27 = vadd.f32 %v291_v23, %v963_v7 }
  0xfa   :  { %v366_v28 = vmax.f32 %v210_v20, 0.0  ;;  %v398_v29 = vmax.f32 %v290_v21, 0.0 }
  0xfb   :  { %v704_v30 = vpack.c.bf16 %v365_v24, %v364_v18  ;;  %v720_v31 = vpack.c.bf16 %v397_v25, %v396_v19  ;;  %v367_v32 = vmax.f32 %v212_v26, 0.0  ;;  %v399_v33 = vmax.f32 %v292_v27, 0.0 }
  0xfd   :  { %620 = vst [vmem:[%s1128_s3] sm:$0xff] %v704_v30  ;;  %636 = vst [vmem:[%s1128_s3 + $0x80] sm:$0xff] %v720_v31  ;;  %v705_v34 = vpack.c.bf16 %v367_v32, %v366_v28  ;;  %v721_v35 = vpack.c.bf16 %v399_v33, %v398_v29  ;;  %v215_v36 = vpop.f32.mrb[4].mxu0  ;;  %v295_v37 = vpop.f32.mrb[4].mxu1 }
  0xfe   :  { %v216_v38 = vadd.f32 %v215_v36, %v961_v6  ;;  %v296_v39 = vadd.f32 %v295_v37, %v961_v6  ;;  %v217_v40 = vpop.f32.mrb[5].mxu0  ;;  %v297_v41 = vpop.f32.mrb[5].mxu1 }
  0xff   :  { %621 = vst [vmem:[%s1128_s3 + $0x8] sm:$0xff] %v705_v34  ;;  %637 = vst [vmem:[%s1128_s3 + $0x88] sm:$0xff] %v721_v35  ;;  %v218_v42 = vadd.f32 %v217_v40, %v963_v7  ;;  %v298_v43 = vadd.f32 %v297_v41, %v963_v7  ;;  %v219_v44 = vpop.f32.mrb[6].mxu0  ;;  %v299_v45 = vpop.f32.mrb[6].mxu1 }
 0x100   :  { %v368_v46 = vmax.f32 %v216_v38, 0.0  ;;  %v400_v47 = vmax.f32 %v296_v39, 0.0  ;;  %v220_v48 = vadd.f32 %v219_v44, %v961_v6  ;;  %v300_v49 = vadd.f32 %v299_v45, %v961_v6  ;;  %v221_v50 = vpop.f32.mrb[7].mxu0  ;;  %v301_v51 = vpop.f32.mrb[7].mxu1 }
 0x101   :  { %v369_v52 = vmax.f32 %v218_v42, 0.0  ;;  %v401_v53 = vmax.f32 %v298_v43, 0.0  ;;  %v222_v54 = vadd.f32 %v221_v50, %v963_v7  ;;  %v302_v55 = vadd.f32 %v301_v51, %v963_v7 }
 0x102   :  { %v370_v56 = vmax.f32 %v220_v48, 0.0  ;;  %v402_v57 = vmax.f32 %v300_v49, 0.0 }
 0x103   :  { %v706_v58 = vpack.c.bf16 %v369_v52, %v368_v46  ;;  %v722_v59 = vpack.c.bf16 %v401_v53, %v400_v47  ;;  %v371_v60 = vmax.f32 %v222_v54, 0.0  ;;  %v403_v61 = vmax.f32 %v302_v55, 0.0 }
 0x105   :  { %622 = vst [vmem:[%s1128_s3 + $0x10] sm:$0xff] %v706_v58  ;;  %638 = vst [vmem:[%s1128_s3 + $0x90] sm:$0xff] %v722_v59  ;;  %v707_v62 = vpack.c.bf16 %v371_v60, %v370_v56  ;;  %v723_v63 = vpack.c.bf16 %v403_v61, %v402_v57  ;;  %v225_v0 = vpop.f32.mrb[8].mxu0  ;;  %v305_v2 = vpop.f32.mrb[8].mxu1 }
 0x106   :  { %v226_v3 = vadd.f32 %v225_v0, %v961_v6  ;;  %v306_v4 = vadd.f32 %v305_v2, %v961_v6  ;;  %v227_v1 = vpop.f32.mrb[9].mxu0  ;;  %v307_v5 = vpop.f32.mrb[9].mxu1 }
 0x107   :  { %623 = vst [vmem:[%s1128_s3 + $0x18] sm:$0xff] %v707_v62  ;;  %639 = vst [vmem:[%s1128_s3 + $0x98] sm:$0xff] %v723_v63  ;;  %v228_v8 = vadd.f32 %v227_v1, %v963_v7  ;;  %v308_v9 = vadd.f32 %v307_v5, %v963_v7  ;;  %v229_v10 = vpop.f32.mrb[10].mxu0  ;;  %v309_v11 = vpop.f32.mrb[10].mxu1 }
 0x108   :  { %v372_v12 = vmax.f32 %v226_v3, 0.0  ;;  %v404_v13 = vmax.f32 %v306_v4, 0.0  ;;  %v230_v14 = vadd.f32 %v229_v10, %v961_v6  ;;  %v310_v15 = vadd.f32 %v309_v11, %v961_v6  ;;  %v231_v16 = vpop.f32.mrb[11].mxu0  ;;  %v311_v17 = vpop.f32.mrb[11].mxu1 }
 0x109   :  { %v373_v18 = vmax.f32 %v228_v8, 0.0  ;;  %v405_v19 = vmax.f32 %v308_v9, 0.0  ;;  %v232_v20 = vadd.f32 %v231_v16, %v963_v7  ;;  %v312_v21 = vadd.f32 %v311_v17, %v963_v7 }
 0x10a   :  { %v374_v22 = vmax.f32 %v230_v14, 0.0  ;;  %v406_v23 = vmax.f32 %v310_v15, 0.0 }
 0x10b   :  { %v708_v24 = vpack.c.bf16 %v373_v18, %v372_v12  ;;  %v724_v25 = vpack.c.bf16 %v405_v19, %v404_v13  ;;  %v375_v26 = vmax.f32 %v232_v20, 0.0  ;;  %v407_v27 = vmax.f32 %v312_v21, 0.0 }
 0x10d   :  { %624 = vst [vmem:[%s1128_s3 + $0x20] sm:$0xff] %v708_v24  ;;  %640 = vst [vmem:[%s1128_s3 + $0xa0] sm:$0xff] %v724_v25  ;;  %v709_v28 = vpack.c.bf16 %v375_v26, %v374_v22  ;;  %v725_v29 = vpack.c.bf16 %v407_v27, %v406_v23  ;;  %v235_v30 = vpop.f32.mrb[12].mxu0  ;;  %v315_v31 = vpop.f32.mrb[12].mxu1 }
 0x10e   :  { %v236_v32 = vadd.f32 %v235_v30, %v961_v6  ;;  %v316_v33 = vadd.f32 %v315_v31, %v961_v6  ;;  %v237_v34 = vpop.f32.mrb[13].mxu0  ;;  %v317_v35 = vpop.f32.mrb[13].mxu1 }
 0x10f   :  { %625 = vst [vmem:[%s1128_s3 + $0x28] sm:$0xff] %v709_v28  ;;  %641 = vst [vmem:[%s1128_s3 + $0xa8] sm:$0xff] %v725_v29  ;;  %v238_v36 = vadd.f32 %v237_v34, %v963_v7  ;;  %v318_v37 = vadd.f32 %v317_v35, %v963_v7  ;;  %v239_v38 = vpop.f32.mrb[14].mxu0  ;;  %v319_v39 = vpop.f32.mrb[14].mxu1 }
 0x110   :  { %v376_v40 = vmax.f32 %v236_v32, 0.0  ;;  %v408_v41 = vmax.f32 %v316_v33, 0.0  ;;  %v240_v42 = vadd.f32 %v239_v38, %v961_v6  ;;  %v320_v43 = vadd.f32 %v319_v39, %v961_v6  ;;  %v241_v44 = vpop.f32.mrb[15].mxu0  ;;  %v321_v45 = vpop.f32.mrb[15].mxu1 }
 0x111   :  { %v377_v46 = vmax.f32 %v238_v36, 0.0  ;;  %v409_v47 = vmax.f32 %v318_v37, 0.0  ;;  %v242_v48 = vadd.f32 %v241_v44, %v963_v7  ;;  %v322_v49 = vadd.f32 %v321_v45, %v963_v7 }
 0x112   :  { %v378_v50 = vmax.f32 %v240_v42, 0.0  ;;  %v410_v51 = vmax.f32 %v320_v43, 0.0 }
 0x113   :  { %v710_v52 = vpack.c.bf16 %v377_v46, %v376_v40  ;;  %v726_v53 = vpack.c.bf16 %v409_v47, %v408_v41  ;;  %v379_v54 = vmax.f32 %v242_v48, 0.0  ;;  %v411_v55 = vmax.f32 %v322_v49, 0.0 }
 0x115   :  { %626 = vst [vmem:[%s1128_s3 + $0x30] sm:$0xff] %v710_v52  ;;  %642 = vst [vmem:[%s1128_s3 + $0xb0] sm:$0xff] %v726_v53  ;;  %v711_v56 = vpack.c.bf16 %v379_v54, %v378_v50  ;;  %v727_v57 = vpack.c.bf16 %v411_v55, %v410_v51  ;;  %v245_v58 = vpop.f32.mrb[16].mxu0  ;;  %v325_v59 = vpop.f32.mrb[16].mxu1 }
 0x116   :  { %v246_v60 = vadd.f32 %v245_v58, %v961_v6  ;;  %v326_v61 = vadd.f32 %v325_v59, %v961_v6  ;;  %v247_v62 = vpop.f32.mrb[17].mxu0  ;;  %v327_v63 = vpop.f32.mrb[17].mxu1 }
 0x117   :  { %627 = vst [vmem:[%s1128_s3 + $0x38] sm:$0xff] %v711_v56  ;;  %643 = vst [vmem:[%s1128_s3 + $0xb8] sm:$0xff] %v727_v57  ;;  %v248_v0 = vadd.f32 %v247_v62, %v963_v7  ;;  %v328_v2 = vadd.f32 %v327_v63, %v963_v7  ;;  %v249_v3 = vpop.f32.mrb[18].mxu0  ;;  %v329_v4 = vpop.f32.mrb[18].mxu1 }
 0x118   :  { %v380_v1 = vmax.f32 %v246_v60, 0.0  ;;  %v412_v5 = vmax.f32 %v326_v61, 0.0  ;;  %v250_v8 = vadd.f32 %v249_v3, %v961_v6  ;;  %v330_v9 = vadd.f32 %v329_v4, %v961_v6  ;;  %v251_v10 = vpop.f32.mrb[19].mxu0  ;;  %v331_v11 = vpop.f32.mrb[19].mxu1 }
 0x119   :  { %v381_v12 = vmax.f32 %v248_v0, 0.0  ;;  %v413_v13 = vmax.f32 %v328_v2, 0.0  ;;  %v252_v14 = vadd.f32 %v251_v10, %v963_v7  ;;  %v332_v15 = vadd.f32 %v331_v11, %v963_v7 }
 0x11a   :  { %v382_v16 = vmax.f32 %v250_v8, 0.0  ;;  %v414_v17 = vmax.f32 %v330_v9, 0.0 }
 0x11b   :  { %v712_v18 = vpack.c.bf16 %v381_v12, %v380_v1  ;;  %v728_v19 = vpack.c.bf16 %v413_v13, %v412_v5  ;;  %v383_v20 = vmax.f32 %v252_v14, 0.0  ;;  %v415_v21 = vmax.f32 %v332_v15, 0.0 }
 0x11d   :  { %628 = vst [vmem:[%s1128_s3 + $0x40] sm:$0xff] %v712_v18  ;;  %644 = vst [vmem:[%s1128_s3 + $0xc0] sm:$0xff] %v728_v19  ;;  %v713_v22 = vpack.c.bf16 %v383_v20, %v382_v16  ;;  %v729_v23 = vpack.c.bf16 %v415_v21, %v414_v17  ;;  %v255_v24 = vpop.f32.mrb[20].mxu0  ;;  %v335_v25 = vpop.f32.mrb[20].mxu1 }
 0x11e   :  { %v256_v26 = vadd.f32 %v255_v24, %v961_v6  ;;  %v336_v27 = vadd.f32 %v335_v25, %v961_v6  ;;  %v257_v28 = vpop.f32.mrb[21].mxu0  ;;  %v337_v29 = vpop.f32.mrb[21].mxu1 }
 0x11f   :  { %629 = vst [vmem:[%s1128_s3 + $0x48] sm:$0xff] %v713_v22  ;;  %645 = vst [vmem:[%s1128_s3 + $0xc8] sm:$0xff] %v729_v23  ;;  %v258_v30 = vadd.f32 %v257_v28, %v963_v7  ;;  %v338_v31 = vadd.f32 %v337_v29, %v963_v7  ;;  %v259_v32 = vpop.f32.mrb[22].mxu0  ;;  %v339_v33 = vpop.f32.mrb[22].mxu1 }
 0x120   :  { %v384_v34 = vmax.f32 %v256_v26, 0.0  ;;  %v416_v35 = vmax.f32 %v336_v27, 0.0  ;;  %v260_v36 = vadd.f32 %v259_v32, %v961_v6  ;;  %v340_v37 = vadd.f32 %v339_v33, %v961_v6  ;;  %v261_v38 = vpop.f32.mrb[23].mxu0  ;;  %v341_v39 = vpop.f32.mrb[23].mxu1 }
 0x121   :  { %v385_v40 = vmax.f32 %v258_v30, 0.0  ;;  %v417_v41 = vmax.f32 %v338_v31, 0.0  ;;  %v262_v42 = vadd.f32 %v261_v38, %v963_v7  ;;  %v342_v43 = vadd.f32 %v341_v39, %v963_v7 }
 0x122   :  { %v386_v44 = vmax.f32 %v260_v36, 0.0  ;;  %v418_v45 = vmax.f32 %v340_v37, 0.0 }
 0x123   :  { %v714_v46 = vpack.c.bf16 %v385_v40, %v384_v34  ;;  %v730_v47 = vpack.c.bf16 %v417_v41, %v416_v35  ;;  %v387_v48 = vmax.f32 %v262_v42, 0.0  ;;  %v419_v49 = vmax.f32 %v342_v43, 0.0 }
 0x125   :  { %630 = vst [vmem:[%s1128_s3 + $0x50] sm:$0xff] %v714_v46  ;;  %646 = vst [vmem:[%s1128_s3 + $0xd0] sm:$0xff] %v730_v47  ;;  %v715_v50 = vpack.c.bf16 %v387_v48, %v386_v44  ;;  %v731_v51 = vpack.c.bf16 %v419_v49, %v418_v45  ;;  %v265_v52 = vpop.f32.mrb[24].mxu0  ;;  %v345_v53 = vpop.f32.mrb[24].mxu1 }
 0x126   :  { %v266_v54 = vadd.f32 %v265_v52, %v961_v6  ;;  %v346_v55 = vadd.f32 %v345_v53, %v961_v6  ;;  %v267_v56 = vpop.f32.mrb[25].mxu0  ;;  %v347_v57 = vpop.f32.mrb[25].mxu1 }
 0x127   :  { %631 = vst [vmem:[%s1128_s3 + $0x58] sm:$0xff] %v715_v50  ;;  %647 = vst [vmem:[%s1128_s3 + $0xd8] sm:$0xff] %v731_v51  ;;  %v268_v58 = vadd.f32 %v267_v56, %v963_v7  ;;  %v348_v59 = vadd.f32 %v347_v57, %v963_v7  ;;  %v269_v60 = vpop.f32.mrb[26].mxu0  ;;  %v349_v61 = vpop.f32.mrb[26].mxu1 }
 0x128   :  { %v388_v62 = vmax.f32 %v266_v54, 0.0  ;;  %v420_v63 = vmax.f32 %v346_v55, 0.0  ;;  %v270_v0 = vadd.f32 %v269_v60, %v961_v6  ;;  %v350_v2 = vadd.f32 %v349_v61, %v961_v6  ;;  %v271_v3 = vpop.f32.mrb[27].mxu0  ;;  %v351_v4 = vpop.f32.mrb[27].mxu1 }
 0x129   :  { %v389_v1 = vmax.f32 %v268_v58, 0.0  ;;  %v421_v5 = vmax.f32 %v348_v59, 0.0  ;;  %v272_v8 = vadd.f32 %v271_v3, %v963_v7  ;;  %v352_v9 = vadd.f32 %v351_v4, %v963_v7 }
 0x12a   :  { %v390_v10 = vmax.f32 %v270_v0, 0.0  ;;  %v422_v11 = vmax.f32 %v350_v2, 0.0 }
 0x12b   :  { %v716_v12 = vpack.c.bf16 %v389_v1, %v388_v62  ;;  %v732_v13 = vpack.c.bf16 %v421_v5, %v420_v63  ;;  %v391_v14 = vmax.f32 %v272_v8, 0.0  ;;  %v423_v15 = vmax.f32 %v352_v9, 0.0 }
 0x12d   :  { %632 = vst [vmem:[%s1128_s3 + $0x60] sm:$0xff] %v716_v12  ;;  %648 = vst [vmem:[%s1128_s3 + $0xe0] sm:$0xff] %v732_v13  ;;  %v717_v16 = vpack.c.bf16 %v391_v14, %v390_v10  ;;  %v733_v17 = vpack.c.bf16 %v423_v15, %v422_v11  ;;  %v275_v18 = vpop.f32.mrb[28].mxu0  ;;  %v355_v19 = vpop.f32.mrb[28].mxu1 }
 0x12e   :  { %v276_v20 = vadd.f32 %v275_v18, %v961_v6  ;;  %v356_v21 = vadd.f32 %v355_v19, %v961_v6  ;;  %v277_v22 = vpop.f32.mrb[29].mxu0  ;;  %v357_v23 = vpop.f32.mrb[29].mxu1 }
 0x12f   :  { %633 = vst [vmem:[%s1128_s3 + $0x68] sm:$0xff] %v717_v16  ;;  %649 = vst [vmem:[%s1128_s3 + $0xe8] sm:$0xff] %v733_v17  ;;  %v278_v24 = vadd.f32 %v277_v22, %v963_v7  ;;  %v358_v25 = vadd.f32 %v357_v23, %v963_v7  ;;  %v279_v26 = vpop.f32.mrb[30].mxu0  ;;  %v359_v27 = vpop.f32.mrb[30].mxu1 }
 0x130   :  { %v392_v28 = vmax.f32 %v276_v20, 0.0  ;;  %v424_v29 = vmax.f32 %v356_v21, 0.0  ;;  %v280_v30 = vadd.f32 %v279_v26, %v961_v6  ;;  %v360_v31 = vadd.f32 %v359_v27, %v961_v6  ;;  %v281_v32 = vpop.f32.mrb[31].mxu0  ;;  %v361_v33 = vpop.f32.mrb[31].mxu1 }
 0x131   :  { %v393_v34 = vmax.f32 %v278_v24, 0.0  ;;  %v425_v35 = vmax.f32 %v358_v25, 0.0  ;;  %v282_v36 = vadd.f32 %v281_v32, %v963_v7  ;;  %v362_v37 = vadd.f32 %v361_v33, %v963_v7 }
 0x132   :  { %v394_v38 = vmax.f32 %v280_v30, 0.0  ;;  %v426_v39 = vmax.f32 %v360_v31, 0.0 }
 0x133   :  { %v718_v40 = vpack.c.bf16 %v393_v34, %v392_v28  ;;  %v734_v41 = vpack.c.bf16 %v425_v35, %v424_v29  ;;  %v395_v42 = vmax.f32 %v282_v36, 0.0  ;;  %v427_v43 = vmax.f32 %v362_v37, 0.0 }
 0x135   :  { %634 = vst [vmem:[%s1128_s3 + $0x70] sm:$0xff] %v718_v40  ;;  %650 = vst [vmem:[%s1128_s3 + $0xf0] sm:$0xff] %v734_v41  ;;  %v719_v6 = vpack.c.bf16 %v395_v42, %v394_v38  ;;  %v735_v44 = vpack.c.bf16 %v427_v43, %v426_v39 }
 0x137   :  { %635 = vst [vmem:[%s1128_s3 + $0x78] sm:$0xff] %v719_v6  ;;  %651 = vst [vmem:[%s1128_s3 + $0xf8] sm:$0xff] %v735_v44 }

</bundles_post_ra>
